<compile_context>
chip_gen: v7x
topology: tpu7x:2x2x1
jax: 0.10.0
libtpu: 0.0.40
codegen_flags: <defaults>
</compile_context>

<pallas_src>
import math

import jax
import jax.numpy as jnp
from jax.experimental import pallas as pl
from jax.experimental.pallas import tpu as pltpu


def make_positional_encoding(max_len, d_model, n=10000.0, dtype=jnp.float32):
    """Build the (1, max_len, d_model) sin/cos PE table in the working dtype."""
    if d_model % 2 != 0:
        # Same latent assumption as the PyTorch original; make it explicit.
        raise ValueError(f"d_model must be even for sin/cos interleave, got {d_model}")
    position = jnp.arange(max_len, dtype=jnp.float32)[:, None]              # (max_len, 1)
    div_term = jnp.exp(
        jnp.arange(0, d_model, 2, dtype=jnp.float32) * (-math.log(n) / d_model)
    )                                                                        # (d_model/2,)
    pe = jnp.zeros((max_len, d_model), jnp.float32)
    pe = pe.at[:, 0::2].set(jnp.sin(position * div_term))
    pe = pe.at[:, 1::2].set(jnp.cos(position * div_term))
    return pe[None, :, :].astype(dtype)                                      # (1, max_len, d_model)


def _add_pe_kernel(x_ref, pe_ref, o_ref):
    # x_ref / o_ref: (1, rows, lanes) tile of one batch element.
    # pe_ref:        (rows, lanes)    tile shared by every batch element.
    o_ref[0] = x_ref[0] + pe_ref[...]


def _sublane_multiple(dtype):
    # f32 -> 8, bf16 -> 16, int8/fp8 -> 32 (dense sublane packing).
    return max(8, 32 // jnp.dtype(dtype).itemsize)


def _pick_row_block(n_rows, lane, itemsize, sm, target_bytes, want_two_tiles):
    """Rows per block: sublane-dense multiple of `sm`, capped by the byte budget.

    Direct arithmetic (no divisor scan); non-dividing tiles are handled by a
    cdiv grid with a masked edge tile.  A block equal to the full row extent
    is always layout-legal.
    """
    row_bytes = lane * itemsize
    r = (target_bytes // row_bytes // sm) * sm
    r = max(r, sm)                       # at least one dense sublane group
    if r >= n_rows:
        r = n_rows                       # full-dim block
    if want_two_tiles and r >= n_rows and n_rows >= 2 * sm:
        # Guarantee >= 2 parallel grid steps so v7x's two TensorCores (and
        # v5e/v6e megacore sharding) both get work.
        half = -(-n_rows // 2)
        r = -(-half // sm) * sm
    return r


def _tiled_add_pe(x3, pe2, *, target_block_bytes, vmem_limit_bytes):
    """x3: (B, R, L), pe2: (R, L) -> x3 + pe2[None], tiled over (row, batch)."""
    B, R, L = x3.shape
    assert pe2.shape == (R, L) and pe2.dtype == x3.dtype
    itemsize = jnp.dtype(x3.dtype).itemsize
    sm = _sublane_multiple(x3.dtype)
    r_block = _pick_row_block(R, L, itemsize, sm, target_block_bytes,
                              want_two_tiles=(B == 1))
    n_r = pl.cdiv(R, r_block)

    return pl.pallas_call(
        _add_pe_kernel,
        out_shape=jax.ShapeDtypeStruct((B, R, L), x3.dtype),
        # Row-tile axis OUTER, batch axis INNER: the pe block index only
        # depends on the outer axis, so each pe tile is DMA'd once and reused
        # for every batch element.  Both axes are independent -> "parallel".
        grid=(n_r, B),
        in_specs=[
            pl.BlockSpec((1, r_block, L), lambda r, b: (b, r, 0)),   # x
            pl.BlockSpec((r_block, L), lambda r, b: (r, 0)),         # pe
        ],
        out_specs=pl.BlockSpec((1, r_block, L), lambda r, b: (b, r, 0)),
        input_output_aliases={0: 0},     # in-place: x buffer reused for out
        compiler_params=pltpu.CompilerParams(
            dimension_semantics=("parallel", "parallel"),
            vmem_limit_bytes=vmem_limit_bytes,
        ),
    )(x3, pe2)


def positional_encoding_forward(x, pe_full, *, target_block_bytes=4 << 20,
                                vmem_limit_bytes=48 << 20):
    """x: (B, S, D); pe_full: (1, max_len, D). Returns x + pe_full[:, :S, :]."""
    B, S, D = x.shape
    _, max_len, D_pe = pe_full.shape
    if D_pe != D:
        raise ValueError(f"pe d_model {D_pe} != x d_model {D}")
    if S > max_len:
        raise ValueError(f"sequence length {S} exceeds max_len {max_len}")

    pe = pe_full[0, :S, :]
    if pe.dtype != x.dtype:
        # Avoid this path by building pe in the working dtype at init.
        pe = pe.astype(x.dtype)

    # Group k consecutive sequence positions per row so the lane dim k*D is a
    # multiple of 128 (lane-dense, unmasked vst) while the sublane dim is the
    # row tile (independent of B).  Contiguous reshapes: no data movement.
    k = math.lcm(D, 128) // D
    if S % k == 0:
        L = k * D
        x3 = x.reshape(B, S // k, L)
        pe2 = pe.reshape(S // k, L)
    else:
        # Fallback: lane dim = D (full last dim -> always layout-legal; stores
        # are masked if D % 128 != 0 but the tiling/pipelining is unchanged).
        L = D
        x3 = x
        pe2 = pe

    out = _tiled_add_pe(x3, pe2,
                        target_block_bytes=target_block_bytes,
                        vmem_limit_bytes=vmem_limit_bytes)
    return out.reshape(B, S, D)


if __name__ == "__main__":
    # Small shapes consistent with the module's forward: x is (B, S, D).
    max_len = 16
    d_model = 32
    batch = 2
    seq = 8

    key = jax.random.PRNGKey(0)
    x = jax.random.normal(key, (batch, seq, d_model), dtype=jnp.float32)

    # pe built once at "init", already in the working dtype (no per-call cast).
    pe_full = make_positional_encoding(max_len, d_model, n=10000.0, dtype=x.dtype)

    # Reference first (plain JAX), so x can then be donated to the in-place kernel.
    ref = x + pe_full[:, :seq, :]
    ref = jax.block_until_ready(ref)

    fwd = jax.jit(positional_encoding_forward, donate_argnums=(0,))
    out = jax.block_until_ready(fwd(x, pe_full))

    assert out.shape == (batch, seq, d_model)
    assert jnp.allclose(out, ref, atol=1e-6), "mismatch vs reference"

    print("KERNEL_OK")
</pallas_src>

<mosaic_0001>
module attributes {stable_mosaic.version = 11 : i64} {
  func.func @_add_pe_kernel(%arg0: i32, %arg1: i32, %arg2: memref<1x2x128xf32, #tpu.memory_space<vmem>>, %arg3: memref<2x128xf32, #tpu.memory_space<vmem>>, %arg4: memref<1x2x128xf32, #tpu.memory_space<vmem>>) attributes {dimension_semantics = [#tpu.dimension_semantics<parallel>, #tpu.dimension_semantics<parallel>], iteration_bounds = array<i64: 1, 2>, scalar_prefetch = 0 : i64, scratch_operands = 0 : i64, tpu.core_type = #tpu.core_type<tc>, window_params = [{transform_indices = @transform_0, window_bounds = array<i64: 1, 2, 128>}, {transform_indices = @transform_1, window_bounds = array<i64: 2, 128>}, {transform_indices = @transform_2, window_bounds = array<i64: 1, 2, 128>}]} {
    %c0 = arith.constant 0 : index
    %c0_0 = arith.constant 0 : index
    %c0_1 = arith.constant 0 : index
    %0 = vector.load %arg2[%c0, %c0_0, %c0_1] : memref<1x2x128xf32, #tpu.memory_space<vmem>>, vector<1x2x128xf32>
    %1 = vector.shape_cast %0 : vector<1x2x128xf32> to vector<2x128xf32>
    %c0_2 = arith.constant 0 : index
    %c0_3 = arith.constant 0 : index
    %2 = vector.load %arg3[%c0_2, %c0_3] : memref<2x128xf32, #tpu.memory_space<vmem>>, vector<2x128xf32>
    %3 = arith.addf %1, %2 : vector<2x128xf32>
    %c0_4 = arith.constant 0 : index
    %c0_5 = arith.constant 0 : index
    %c0_6 = arith.constant 0 : index
    %4 = vector.load %arg4[%c0_4, %c0_5, %c0_6] : memref<1x2x128xf32, #tpu.memory_space<vmem>>, vector<1x2x128xf32>
    %5 = vector.shape_cast %4 : vector<1x2x128xf32> to vector<2x128xf32>
    %6 = vector.shape_cast %3 : vector<2x128xf32> to vector<1x2x128xf32>
    tpu.vector_store %arg4[%c0_4, %c0_5, %c0_6], %6 {strides = array<i32>} : memref<1x2x128xf32, #tpu.memory_space<vmem>>, vector<1x2x128xf32>,
    return
  }
  func.func @transform_0(%arg0: i32, %arg1: i32) -> (i32, i32, i32) {
    %c0_i32 = arith.constant 0 : i32
    %c0_i32_0 = arith.constant 0 : i32
    return %arg1, %arg0, %c0_i32 : i32, i32, i32
  }
  func.func @transform_1(%arg0: i32, %arg1: i32) -> (i32, i32) {
    %c0_i32 = arith.constant 0 : i32
    %c0_i32_0 = arith.constant 0 : i32
    return %arg0, %c0_i32 : i32, i32
  }
  func.func @transform_2(%arg0: i32, %arg1: i32) -> (i32, i32, i32) {
    %c0_i32 = arith.constant 0 : i32
    %c0_i32_0 = arith.constant 0 : i32
    return %arg1, %arg0, %c0_i32 : i32, i32, i32
  }
}

</mosaic_0001>

<bundles_post_ra>
// kernel: squeeze.1
= control target key start
LH: loop header
LB: loop body
LE: loop exit
PB: predicated region body
PF: predicated region fallthrough
CT: control target
= control target key end

     0   :  { %s7_s6 = smov 3  ;;  %s14_s9 = smov 3  ;;  %vm4_vm0 = vcmask 261120   ;;  %vm11_vm1 = vcmask 1048320   ;;  %vm18_vm2 = vcmask 785920   ;;  %vm25_vm3 = vcmask 523520   ;;  %s67_s0 = inlined_call_operand.vmem [shape: f32[1,8,32], index: 0, kind: input, shape index: {}]   ;;  %s68_s1 = inlined_call_operand.vmem [shape: f32[2,128], index: 1, kind: output, shape index: {}]  }
   0x1   :  { %v33_v0 = vld [vmem:[%s67_s0 + $0x3] ss:$4 sm:%s7_s6]   ;;  %s39_s10 = smov 96   ;;  %s21_s11 = smov 3  ;;  %v34_v1 = vld [vmem:[%s67_s0 + $0x2] ss:$4 sm:%s14_s9]  }
   0x2   :  { %9 = vrot.lane.b32.xlu0 %v33_v0, %s39_s10  ;;  %v35_v2 = vld [vmem:[%s67_s0 + $0x1] ss:$4 sm:%s21_s11]   ;;  %s2_s16 = smov 3  ;;  %s40_s17 = smov 32  }
   0x3   :  { %23 = vrot.lane.b32.xlu1 %v35_v2, %s40_s17  ;;  %v3_v3 = vld [vmem:[%s67_s0] ss:$4 sm:%s2_s16]   ;;  %s41_s0 = smov 64  }
   0x4   :  { %5 = vst.msk [vmem:[#allocation0] sm:$0x3] %vm4_vm0, %v3_v3  }
   0x6   :  { %16 = vrot.lane.b32.xlu0 %v34_v1, %s41_s0 }
  0x74   :  { %v10_v4 = vpop.permute.xlu0 %9  }
  0x75   :  { %12 = vst.msk [vmem:[#allocation0] sm:$0x3] %vm11_vm1, %v10_v4   ;;  %v24_v5 = vpop.permute.xlu1 %23  }
  0x78   :  { %v17_v6 = vpop.permute.xlu0 %16  }
  0x79   :  { %19 = vst.msk [vmem:[#allocation0] sm:$0x3] %vm18_vm2, %v17_v6  }
  0x7a   :  { %26 = vst.msk [vmem:[#allocation0] sm:$0x3] %vm25_vm3, %v24_v5  }
  0x81   :  { %v30_v7 = vld [vmem:[#allocation0] sm:$0x3] }
  0x82   :  { %32 = vst [vmem:[%s68_s1] sm:$0x3] %v30_v7 }

// kernel: positional_encoding_forward.1
= control target key start
LH: loop header
LB: loop body
LE: loop exit
PB: predicated region body
PF: predicated region fallthrough
CT: control target
= control target key end

     0   :  { %s354_s9 = smov 0   ;;  %s331_s10 = smov 0   ;;  %s368_s0 = inlined_call_operand.vmem [shape: f32[2,2,128], index: 0, kind: input, shape index: {}, may-alias: {0,2}]   ;;  %s369_s1 = inlined_call_operand.vmem [shape: f32[2,128], index: 1, kind: input, shape index: {}]   ;;  %s370_s2 = inlined_call_operand.vmem [shape: f32[2,2,128], index: 2, kind: output, shape index: {}, may-alias: {0,2}]  }
   0x1   :  { %s335_s11 = smov 0  }
   0x2 LB: > { %s21_s12 = sadd.s32 1, %s333_s10  ;;  %p286_p0 = scmp.ge.s32.totalorder %s337_s11, 1  ;;  %s337_s11 = sphi %s335_s11, %s12_s11   ;;  %s333_s10 = sphi %s331_s10, %s332_s10   ;;  %s329_s9 = sphi %s354_s9, %s371_s9  }
   0x3   : > { %p22_p1 = scmp.ge.s32.totalorder %s21_s12, 2  ;;  %p139_p2 = scmp.lt.s32.totalorder %s337_s11, 3 }
   0x5   : > { %s373_s12 = smov (%p22_p1, %s21_s12), 0  ;;  %p140_p3 = pnand %p286_p0, %p139_p2 }
   0x6   : > { %p169_p4 = scmp.lt.s32.totalorder (!%p140_p3), %s329_s9, 1  ;;  %v188_v0 = vld [vmem:[%s369_s1] sm:$0x3] (!%p140_p3) }
   0x7   : > { %143 = sbr.rel (%p140_p3) target bundleno = 21 (0x15), region = 28 }
   0xe   : > { %s375_s9 = smov (!%p169_p4, %s329_s9), 1 }
   0xf   : > { %s287_s13 = sshll.u32 %s375_s9, 1 }
  0x10   : > { %s175_s18 = scalar_lea.vmem %s368_s0, %s287_s13  ;;  %s186_s21 = scalar_lea.vmem %s370_s2, %s287_s13 }
  0x11   : > { %v187_v1 = vld [vmem:[%s175_s18] sm:$0x3] }
  0x12   : > { %v189_v2 = vadd.f32 %v188_v0, %v187_v1 }
  0x14   : > { %190 = vst [vmem:[%s186_s21] sm:$0x3] %v189_v2 }
  0x15 PF: > { %s12_s11 = sadd.s32 1, %s337_s11   ;;  %s371_s9 = smov %s333_s10 }
  0x16   : > { %p9_p5 = scmp.ge.s32.totalorder %s12_s11, 4   ;;  %s332_s10 = smov %s373_s12  }
  0x18   :  { %11 = sbr.rel (!%p9_p5) target bundleno = 2 (0x2), region = 61 }

</bundles_post_ra>
